<compile_context>
chip_gen: v5e
topology: v5e:2x2
jax: 0.10.0
libtpu: 0.0.40
codegen_flags: <defaults>
</compile_context>

<pallas_src>
import jax
import jax.numpy as jnp
from jax import lax
from jax.experimental import pallas as pl
from jax.experimental.pallas import tpu as pltpu


def _round_up(x, m):
    return ((x + m - 1) // m) * m


def _sublane(dtype) -> int:
    itemsize = jnp.dtype(dtype).itemsize
    return {4: 8, 2: 16, 1: 32}.get(itemsize, 8)


def _choose_m_tiling(M, tm_max, sublane):
    """Pick (tm, M_pad).  Prefers no padding (avoids a post-kernel slice copy)."""
    if M <= tm_max:
        # Single full-extent block: allowed regardless of sublane alignment.
        return M, M
    tm_cap = max(sublane, (tm_max // sublane) * sublane)
    # Prefer the largest multiple-of-sublane divisor of M (no padding, no slice),
    # as long as it is not so small that per-step overhead dominates.
    for t in range(tm_cap, 0, -sublane):
        if M % t == 0 and 4 * t >= tm_cap:
            return t, M
    return tm_cap, _round_up(M, tm_cap)


def _patch_embed_kernel(p_ref, w_ref, b_ref, o_ref):
    # p_ref: (tm, K) flattened patches
    # w_ref: (K, tn) projection weight (contraction on K is dim1 x dim0 -> MXU
    #        sees a non-transposed RHS; no per-step XLU transpose)
    # b_ref: (1, tn) bias (broadcast over tm)
    # o_ref: (tm, tn) output tile
    acc = jnp.dot(p_ref[...], w_ref[...], preferred_element_type=jnp.float32)
    acc = acc + b_ref[...].astype(jnp.float32)
    o_ref[...] = acc.astype(o_ref.dtype)


def patch_embed_pallas(x, weight, bias, patch_size, *,
                       tm_max=1024, tn_max=1536, compute_dtype=None):
    """x: (B, C, H, W) NCHW; weight: (E, C, ph, pw) PyTorch conv layout;
    bias: (E,).  Returns (B, num_patches, E)."""
    B, C, H, W = x.shape
    E = weight.shape[0]
    ph, pw = patch_size
    assert H % ph == 0 and W % pw == 0
    gh, gw = H // ph, W // pw
    num_patches = gh * gw
    K = C * ph * pw
    M = B * num_patches
    out_dtype = x.dtype

    # --- glue: extract non-overlapping patches, flatten in (c, i, j) order ---
    # (B, C, gh, ph, gw, pw) -> (B, gh, gw, C, ph, pw) -> (M, K)
    patches = x.reshape(B, C, gh, ph, gw, pw)
    patches = jnp.transpose(patches, (0, 2, 4, 1, 3, 5)).reshape(M, K)

    # Conv weight (E, C, ph, pw) -> (K, E): tiny one-time host transpose so the
    # kernel contracts lane-vs-sublane (no in-kernel weight transpose).
    w_mat = jnp.transpose(weight.reshape(E, K), (1, 0))

    if compute_dtype is not None:
        patches = patches.astype(compute_dtype)
        w_mat = w_mat.astype(compute_dtype)

    # --- tile sizes ---
    sub = _sublane(patches.dtype)
    tm, M_pad = _choose_m_tiling(M, tm_max, sub)

    if E <= tn_max:
        # Collapse the E axis: whole weight/bias resident in VMEM, patches
        # streamed from HBM exactly once.  Full-extent last dim -> no E padding
        # and no post-kernel slice (masked stores only matter for tiny E).
        tn, E_pad = E, E
    else:
        tn = max(128, (tn_max // 128) * 128)
        E_pad = _round_up(E, tn)

    if M_pad != M:
        patches = jnp.pad(patches, ((0, M_pad - M), (0, 0)))
    if E_pad != E:
        w_mat = jnp.pad(w_mat, ((0, 0), (0, E_pad - E)))
        bias = jnp.pad(bias, (0, E_pad - E))
    b_mat = bias.reshape(1, E_pad)

    n_e = E_pad // tn
    n_m = M_pad // tm

    if n_e == 1:
        # 1-D grid over M; weight/bias block index is constant -> stays resident.
        grid = (n_m,)
        in_specs = [
            pl.BlockSpec((tm, K), lambda i: (i, 0)),   # patches (streamed)
            pl.BlockSpec((K, tn), lambda i: (0, 0)),   # weight  (resident)
            pl.BlockSpec((1, tn), lambda i: (0, 0)),   # bias    (resident)
        ]
        out_spec = pl.BlockSpec((tm, tn), lambda i: (i, 0))
        dims = ("parallel",)
    else:
        # Fallback for very large E: E axis outer (slowest) so the weight/bias
        # tiles keep the same block index across all M tiles.
        grid = (n_e, n_m)
        in_specs = [
            pl.BlockSpec((tm, K), lambda j, i: (i, 0)),
            pl.BlockSpec((K, tn), lambda j, i: (0, j)),
            pl.BlockSpec((1, tn), lambda j, i: (0, j)),
        ]
        out_spec = pl.BlockSpec((tm, tn), lambda j, i: (i, j))
        dims = ("parallel", "parallel")

    # --- explicit VMEM budget (double-buffered working set + headroom),
    #     clamped to [32 MiB, 64 MiB] so it is valid on v5e/v6e/v7x ---
    in_b = jnp.dtype(patches.dtype).itemsize
    w_b = jnp.dtype(w_mat.dtype).itemsize
    o_b = jnp.dtype(out_dtype).itemsize
    vmem_needed = (2 * tm * K * in_b          # patches
                   + 2 * K * tn * w_b         # weight
                   + 2 * tn * w_b             # bias
                   + 2 * tm * tn * o_b)       # output
    vmem_limit = int(min(64 << 20, max(32 << 20, vmem_needed + (8 << 20))))

    cost = pl.CostEstimate(
        flops=2 * M_pad * K * E_pad,
        transcendentals=0,
        bytes_accessed=(M_pad * K * in_b + K * E_pad * w_b
                        + E_pad * w_b + M_pad * E_pad * o_b),
    )

    out = pl.pallas_call(
        _patch_embed_kernel,
        out_shape=jax.ShapeDtypeStruct((M_pad, E_pad), out_dtype),
        grid=grid,
        in_specs=in_specs,
        out_specs=out_spec,
        compiler_params=pltpu.CompilerParams(
            dimension_semantics=dims,
            vmem_limit_bytes=vmem_limit),
        cost_estimate=cost,
    )(patches, w_mat, b_mat)

    if M_pad != M or E_pad != E:
        out = out[:M, :E]
    return out.reshape(B, num_patches, E)


def patch_embed_reference(x, weight, bias, patch_size):
    """Pure-JAX reference using a real strided conv (matches PyTorch Conv2d)."""
    ph, pw = patch_size
    y = lax.conv_general_dilated(
        x, weight,
        window_strides=(ph, pw),
        padding="VALID",
        dimension_numbers=("NCHW", "OIHW", "NCHW"),
    )
    y = y + bias.reshape(1, -1, 1, 1)
    B, E, gh, gw = y.shape
    # flatten(2).transpose(1, 2)
    return jnp.transpose(y.reshape(B, E, gh * gw), (0, 2, 1))


def _check(B, C, H, W, patch, E, key, atol=1e-4, rtol=1e-4, **kw):
    kx, kw_, kb = jax.random.split(key, 3)
    x = jax.random.normal(kx, (B, C, H, W), dtype=jnp.float32)
    weight = jax.random.normal(kw_, (E, C, patch[0], patch[1]), dtype=jnp.float32) * 0.02
    bias = jax.random.normal(kb, (E,), dtype=jnp.float32) * 0.02

    out = jax.block_until_ready(patch_embed_pallas(x, weight, bias, patch, **kw))
    ref = jax.block_until_ready(patch_embed_reference(x, weight, bias, patch))

    np_ = (H // patch[0]) * (W // patch[1])
    assert out.shape == (B, np_, E), out.shape
    err = float(jnp.max(jnp.abs(out - ref)))
    assert jnp.allclose(out, ref, atol=atol, rtol=rtol), err


if __name__ == "__main__":
    key = jax.random.PRNGKey(0)
    k1, k2, k3, k4 = jax.random.split(key, 4)

    # Toy shapes consistent with the module's forward:
    # img_size=16, patch_size=8, in_chans=4, embed_dim=32 -> num_patches=4
    # Single-tile 1-D grid, no padding, no post-slice.
    _check(B=2, C=4, H=16, W=16, patch=(8, 8), E=32, key=k1)

    # Multi-step 1-D grid over M (tm_max=8) with the resident (K, E) weight.
    _check(B=2, C=4, H=32, W=32, patch=(8, 8), E=32, key=k2, tm_max=8)

    # 2-D grid fallback (E tiled, E-outer) exercised via small tn_max.
    _check(B=2, C=4, H=32, W=32, patch=(8, 8), E=256, key=k3,
           tm_max=8, tn_max=128)

    # Optional bf16 streaming path (f32 accumulation) with loose tolerance.
    _check(B=2, C=4, H=16, W=16, patch=(8, 8), E=32, key=k4,
           compute_dtype=jnp.bfloat16, atol=2e-2, rtol=2e-2)

    print("KERNEL_OK")
</pallas_src>

<mosaic_0001>
module attributes {stable_mosaic.version = 11 : i64} {
  func.func @_patch_embed_kernel(%arg0: i32, %arg1: memref<8x256xf32, #tpu.memory_space<vmem>>, %arg2: memref<256x32xf32, #tpu.memory_space<vmem>>, %arg3: memref<1x32xf32, #tpu.memory_space<vmem>>, %arg4: memref<8x32xf32, #tpu.memory_space<vmem>>) attributes {dimension_semantics = [#tpu.dimension_semantics<parallel>], iteration_bounds = array<i64: 1>, scalar_prefetch = 0 : i64, scratch_operands = 0 : i64, tpu.core_type = #tpu.core_type<tc>, window_params = [{transform_indices = @transform_0, window_bounds = array<i64: 8, 256>}, {pipeline_mode = #tpu.pipeline_mode<synchronous>, transform_indices = @transform_1, window_bounds = array<i64: 256, 32>}, {pipeline_mode = #tpu.pipeline_mode<synchronous>, transform_indices = @transform_2, window_bounds = array<i64: 1, 32>}, {transform_indices = @transform_3, window_bounds = array<i64: 8, 32>}]} {
    %c0 = arith.constant 0 : index
    %c0_0 = arith.constant 0 : index
    %0 = vector.load %arg1[%c0, %c0_0] : memref<8x256xf32, #tpu.memory_space<vmem>>, vector<8x256xf32>
    %c0_1 = arith.constant 0 : index
    %c0_2 = arith.constant 0 : index
    %1 = vector.load %arg2[%c0_1, %c0_2] : memref<256x32xf32, #tpu.memory_space<vmem>>, vector<256x32xf32>
    %cst = arith.constant dense<0.000000e+00> : vector<8x32xf32>
    %2 = tpu.matmul %0, %1, %cst {dimension_numbers = #tpu.dot_dimension_numbers<[1], [0], [0], [1], [0, 0, 1, 1], [], []>} : vector<8x256xf32>, vector<256x32xf32>, vector<8x32xf32> -> vector<8x32xf32>
    %c0_3 = arith.constant 0 : index
    %c0_4 = arith.constant 0 : index
    %3 = vector.load %arg3[%c0_3, %c0_4] : memref<1x32xf32, #tpu.memory_space<vmem>>, vector<1x32xf32>
    %4 = vector.broadcast %3 : vector<1x32xf32> to vector<8x32xf32>
    %5 = arith.addf %2, %4 : vector<8x32xf32>
    %c0_5 = arith.constant 0 : index
    %c0_6 = arith.constant 0 : index
    %6 = vector.load %arg4[%c0_5, %c0_6] : memref<8x32xf32, #tpu.memory_space<vmem>>, vector<8x32xf32>
    tpu.vector_store %arg4[%c0_5, %c0_6], %5 {strides = array<i32>} : memref<8x32xf32, #tpu.memory_space<vmem>>, vector<8x32xf32>,
    return
  }
  func.func @transform_0(%arg0: i32) -> (i32, i32) {
    %c0_i32 = arith.constant 0 : i32
    %c0_i32_0 = arith.constant 0 : i32
    return %arg0, %c0_i32 : i32, i32
  }
  func.func @transform_1(%arg0: i32) -> (i32, i32) {
    %c0_i32 = arith.constant 0 : i32
    %c0_i32_0 = arith.constant 0 : i32
    %c0_i32_1 = arith.constant 0 : i32
    return %c0_i32, %c0_i32_0 : i32, i32
  }
  func.func @transform_2(%arg0: i32) -> (i32, i32) {
    %c0_i32 = arith.constant 0 : i32
    %c0_i32_0 = arith.constant 0 : i32
    %c0_i32_1 = arith.constant 0 : i32
    return %c0_i32, %c0_i32_0 : i32, i32
  }
  func.func @transform_3(%arg0: i32) -> (i32, i32) {
    %c0_i32 = arith.constant 0 : i32
    %c0_i32_0 = arith.constant 0 : i32
    return %arg0, %c0_i32 : i32, i32
  }
}

</mosaic_0001>

<bundles_post_ra>
// kernel: tpu_custom_call.1
= control target key start
LH: loop header
LB: loop body
LE: loop exit
PB: predicated region body
PF: predicated region fallthrough
CT: control target
= control target key end

     0   :  { %s268_s0 = inlined_call_operand.vmem [shape: f32[8,256], index: 0, kind: input, shape index: {}]   ;;  %s269_s1 = inlined_call_operand.vmem [shape: f32[256,32], index: 1, kind: input, shape index: {}]   ;;  %s270_s2 = inlined_call_operand.vmem [shape: f32[1,32], index: 2, kind: input, shape index: {}]   ;;  %s271_s3 = inlined_call_operand.hbm [shape: f32[8,32], index: 3, kind: output, shape index: {}]  }
   0x1   :  { %v32_v0 = vld [vmem:[%s269_s1 + $0x78] sm:$0xff]  ;;  %v31_v1 = vld [vmem:[%s269_s1 + $0x70] sm:$0xff]  ;;  %v30_v4 = vld [vmem:[%s269_s1 + $0x68] sm:$0xff] }
   0x2   :  { %v48_v2 = vld [vmem:[%s269_s1 + $0xf8] sm:$0xff]  ;;  %53 = vmatpush.msra.mxu0 %v32_v0  ;;  %v47_v3 = vld [vmem:[%s269_s1 + $0xf0] sm:$0xff]  ;;  %v46_v5 = vld [vmem:[%s269_s1 + $0xe8] sm:$0xff] }
   0x3   :  { %73 = vmatpush.msra.mxu1 %v48_v2  ;;  %v29_v6 = vld [vmem:[%s269_s1 + $0x60] sm:$0xff]  ;;  %v28_v8 = vld [vmem:[%s269_s1 + $0x58] sm:$0xff]  ;;  %v27_v10 = vld [vmem:[%s269_s1 + $0x50] sm:$0xff] }
   0x4   :  { %54 = vmatpush.msra.mxu0 %v31_v1  ;;  %v45_v7 = vld [vmem:[%s269_s1 + $0xe0] sm:$0xff]  ;;  %v44_v9 = vld [vmem:[%s269_s1 + $0xd8] sm:$0xff]  ;;  %v43_v11 = vld [vmem:[%s269_s1 + $0xd0] sm:$0xff] }
   0x5   :  { %74 = vmatpush.msra.mxu1 %v47_v3  ;;  %v26_v12 = vld [vmem:[%s269_s1 + $0x48] sm:$0xff]  ;;  %v25_v14 = vld [vmem:[%s269_s1 + $0x40] sm:$0xff] }
   0x6   :  { %55 = vmatpush.msra.mxu0 %v30_v4  ;;  %v42_v13 = vld [vmem:[%s269_s1 + $0xc8] sm:$0xff]  ;;  %v41_v15 = vld [vmem:[%s269_s1 + $0xc0] sm:$0xff] }
   0x7   :  { %75 = vmatpush.msra.mxu1 %v46_v5 }
   0x8   :  { %56 = vmatpush.msra.mxu0 %v29_v6 }
   0x9   :  { %76 = vmatpush.msra.mxu1 %v45_v7 }
   0xa   :  { %57 = vmatpush.msra.mxu0 %v28_v8 }
   0xb   :  { %77 = vmatpush.msra.mxu1 %v44_v9 }
   0xc   :  { %58 = vmatpush.msra.mxu0 %v27_v10 }
   0xd   :  { %78 = vmatpush.msra.mxu1 %v43_v11 }
   0xe   :  { %8 = vsyncpa [#allocation3], 0  ;;  %59 = vmatpush.msra.mxu0 %v26_v12  ;;  %v24_v16 = vld [vmem:[%s269_s1 + $0x38] sm:$0xff]  ;;  %v23_v18 = vld [vmem:[%s269_s1 + $0x30] sm:$0xff]  ;;  %s102_s4 = sshll.u32 %s271_s3, 4  ;;  %vm93_vm0 = vcmask 261120   ;;  %s103_s4 = int_to_ptr.hbm [resolvable:$true] %s102_s4 }
   0xf   :  { %79 = vmatpush.msra.mxu1 %v42_v13  ;;  %v40_v17 = vld [vmem:[%s269_s1 + $0xb8] sm:$0xff]  ;;  %v39_v19 = vld [vmem:[%s269_s1 + $0xb0] sm:$0xff]  ;;  %v22_v20 = vld [vmem:[%s269_s1 + $0x28] sm:$0xff] }
  0x10   :  { %60 = vmatpush.msra.mxu0 %v25_v14  ;;  %v38_v21 = vld [vmem:[%s269_s1 + $0xa8] sm:$0xff]  ;;  %v21_v22 = vld [vmem:[%s269_s1 + $0x20] sm:$0xff]  ;;  %v20_v24 = vld [vmem:[%s269_s1 + $0x18] sm:$0xff] }
  0x11   :  { %80 = vmatpush.msra.mxu1 %v41_v15  ;;  %v37_v23 = vld [vmem:[%s269_s1 + $0xa0] sm:$0xff]  ;;  %v36_v25 = vld [vmem:[%s269_s1 + $0x98] sm:$0xff]  ;;  %v19_v26 = vld [vmem:[%s269_s1 + $0x10] sm:$0xff] }
  0x12   :  { %61 = vmatpush.msra.mxu0 %v24_v16  ;;  %v35_v27 = vld [vmem:[%s269_s1 + $0x90] sm:$0xff]  ;;  %v18_v28 = vld [vmem:[%s269_s1 + $0x8] sm:$0xff]  ;;  %v17_v30 = vld [vmem:[%s269_s1] sm:$0xff] }
  0x13   :  { %81 = vmatpush.msra.mxu1 %v40_v17  ;;  %v34_v29 = vld [vmem:[%s269_s1 + $0x88] sm:$0xff]  ;;  %v33_v31 = vld [vmem:[%s269_s1 + $0x80] sm:$0xff]  ;;  %s139_s1 = smov [#allocation2]  }
  0x14   :  { %62 = vmatpush.msra.mxu0 %v23_v18  ;;  %v15_v32 = vld [vmem:[%s268_s0] sm:$0xff]  ;;  %v16_v33 = vld [vmem:[%s268_s0 + $0x8] sm:$0xff]  ;;  %s100_s28 = sshll.u32 %s139_s1, 4  ;;  %s101_s28 = int_to_ptr.vmem [resolvable:$true] %s100_s28 }
  0x15   :  { %82 = vmatpush.msra.mxu1 %v39_v19  ;;  %v112_v34 = vld [vmem:[%s270_s2] ss:$0 sm:$0xff] }
  0x16   :  { %63 = vmatpush.msra.mxu0 %v22_v20 }
  0x17   :  { %83 = vmatpush.msra.mxu1 %v38_v21 }
  0x18   :  { %64 = vmatpush.msra.mxu0 %v21_v22 }
  0x19   :  { %84 = vmatpush.msra.mxu1 %v37_v23 }
  0x1a   :  { %65 = vmatpush.msra.mxu0 %v20_v24 }
  0x1b   :  { %85 = vmatpush.msra.mxu1 %v36_v25 }
  0x1c   :  { %66 = vmatpush.msra.mxu0 %v19_v26 }
  0x1d   :  { %86 = vmatpush.msra.mxu1 %v35_v27 }
  0x1e   :  { %67 = vmatpush.msra.mxu0 %v18_v28 }
  0x1f   :  { %87 = vmatpush.msra.mxu1 %v34_v29 }
  0x20   :  { %68 = vmatpush.msra.mxu0 %v17_v30 }
  0x21   :  { %88 = vmatpush.msra.mxu1 %v33_v31  ;;  %69 = vmatmul.f32.vlgmr.msra.gmra.mxu0 %v15_v32 }
  0x22   :  { %89 = vmatmul.f32.vlgmr.msra.gmra.mxu1 %v16_v33 }
  0x9e   :  { %v70_v35 = vpop.f32.mrf.mxu0 }
  0x9f   :  { %v90_v36 = vpop.f32.mrf.mxu1  ;;  %v71_v37 = vadd.f32 %v112_v34, %v70_v35 }
  0xa1   :  { %v91_v38 = vadd.f32 %v90_v36, %v71_v37 }
  0xa3   :  { %94 = vst.msk [vmem:[#allocation2] sm:$0xff] %vm93_vm0, %v91_v38 }
  0xa4   :  { %105 = dma.vmem_to_hbm [thread:$0]  %s101_s28, 128, %s103_s4, [#allocation3]  }
  0xa5   :  { %137 = dma.done.wait [#allocation3], 128  }
  0xa6   :  { %138 = vsyncadd [#allocation3], 4294967168 }
  0xa7   :  { %110 = vsyncpa [#allocation3], 1 }

</bundles_post_ra>
